<compile_context>
chip_gen: v7x
topology: tpu7x:2x2x1
jax: 0.10.0
libtpu: 0.0.40
codegen_flags: <defaults>
</compile_context>

<pallas_src>
from functools import partial

import jax
import jax.numpy as jnp
from jax.experimental import pallas as pl
from jax.experimental.pallas import tpu as pltpu


def _poly_policy_kernel(degree, obs_dim, feat_used, feat_pad,
                        x_ref, w_ref, out_ref):
    """x_ref: [B_blk, D], w_ref: [feat_pad, A_pad], out_ref: [B_blk, A_pad]."""
    D = obs_dim
    x = x_ref[...].astype(jnp.float32)                   # [B_blk, D]
    Bb = x.shape[0]

    # Recursive lane-dense polynomial features (same ordering as make_features).
    blocks = [x]
    cur = x
    for _ in range(degree - 1):
        cur = jnp.concatenate([cur * x[:, j:j + 1] for j in range(D)], axis=1)
        blocks.append(cur)

    # Constant-one column: bias (or zero) lives in the matching weight row.
    blocks.append(jnp.ones((Bb, 1), jnp.float32))
    if feat_pad > feat_used:
        # Zero feature lanes pair with zero weight rows -> contribute nothing.
        blocks.append(jnp.zeros((Bb, feat_pad - feat_used), jnp.float32))
    feats = jnp.concatenate(blocks, axis=1)               # [B_blk, feat_pad]

    w = w_ref[...]
    out = jnp.dot(feats.astype(w.dtype), w,               # single MXU pass
                  preferred_element_type=jnp.float32)     # [B_blk, A_pad]
    out_ref[...] = out.astype(out_ref.dtype)


def _round_up(x, m):
    return (x + m - 1) // m * m


def determ_policy_forward(obs, weight, bias, *, degree, add_bias,
                          block_b=512, matmul_dtype=jnp.float32):
    """obs: [B, obs_dim]; weight: [act_dim, feat_dim] (PyTorch nn.Linear layout);
    bias: [act_dim] (used iff add_bias).  Returns action [B, act_dim].

    matmul_dtype=jnp.bfloat16 halves operand/HBM traffic on v6e/v7x (feature
    products stay f32, accumulation stays f32)."""
    B, D = obs.shape
    A = weight.shape[0]
    feat_dim = sum(D ** n for n in range(1, degree + 1))
    assert weight.shape == (A, feat_dim)

    feat_used = feat_dim + 1                    # +1: constant-one (bias) column
    feat_pad = _round_up(feat_used, 128)
    a_pad = _round_up(A, 128)

    # Prepacked lane-dense, zero-padded weight slab; bias folded into one row.
    slab = jnp.zeros((feat_pad, a_pad), matmul_dtype)
    slab = slab.at[:feat_dim, :A].set(weight.T.astype(matmul_dtype))
    if add_bias:
        slab = slab.at[feat_dim, :A].set(bias.astype(matmul_dtype))

    # Batch tiling: pad batch so the block divides it evenly.
    b_pad = _round_up(B, 8)
    if b_pad > block_b:
        b_blk = block_b
        b_pad = _round_up(b_pad, b_blk)
    else:
        b_blk = b_pad
    obs_p = obs if b_pad == B else jnp.pad(obs, ((0, b_pad - B), (0, 0)))

    kernel = partial(_poly_policy_kernel, degree, D, feat_used, feat_pad)

    out = pl.pallas_call(
        kernel,
        out_shape=jax.ShapeDtypeStruct((b_pad, a_pad), jnp.float32),
        grid_spec=pltpu.PrefetchScalarGridSpec(
            num_scalar_prefetch=0,
            grid=(b_pad // b_blk,),
            in_specs=[
                pl.BlockSpec((b_blk, D), lambda i: (i, 0)),         # obs tiles
                pl.BlockSpec((feat_pad, a_pad), lambda i: (0, 0)),  # resident W
            ],
            out_specs=pl.BlockSpec((b_blk, a_pad), lambda i: (i, 0)),
        ),
        compiler_params=pltpu.CompilerParams(
            dimension_semantics=("parallel",)),
    )(obs_p, slab)

    return out[:B, :A].astype(obs.dtype)


def make_features_ref(x, degree):
    """Pure-JAX reference mirroring the PyTorch make_features()."""
    B, _ = x.shape
    feats = []
    a = x
    feats.append(a)
    for _ in range(degree - 1):
        a = (a[:, :, None] * x[:, None, :]).reshape(B, -1)
        feats.append(a)
    return jnp.concatenate(feats, axis=1)


if __name__ == "__main__":
    # Small shapes consistent with the module: obs_dim=4, act_dim=2, degree=3.
    B, obs_dim, act_dim, degree = 8, 4, 2, 3
    feat_dim = sum(obs_dim ** n for n in range(1, degree + 1))  # 4+16+64 = 84

    key = jax.random.PRNGKey(0)
    k_obs, k_w, k_b, k_obs2 = jax.random.split(key, 4)
    obs = jax.random.normal(k_obs, (B, obs_dim), jnp.float32)
    weight = 0.1 * jax.random.normal(k_w, (act_dim, feat_dim), jnp.float32)
    bias = 0.1 * jax.random.normal(k_b, (act_dim,), jnp.float32)

    # with bias
    out = determ_policy_forward(obs, weight, bias, degree=degree, add_bias=True)
    out = jax.block_until_ready(out)
    ref = make_features_ref(obs, degree) @ weight.T + bias
    assert out.shape == (B, act_dim)
    assert jnp.allclose(out, ref, atol=1e-4, rtol=1e-4), (out, ref)

    # without bias
    out_nb = determ_policy_forward(obs, weight, bias, degree=degree, add_bias=False)
    out_nb = jax.block_until_ready(out_nb)
    ref_nb = make_features_ref(obs, degree) @ weight.T
    assert jnp.allclose(out_nb, ref_nb, atol=1e-4, rtol=1e-4), (out_nb, ref_nb)

    # multi-block grid + batch-padding path (grid of 3 blocks of 16 rows)
    B2 = 40
    obs2 = jax.random.normal(k_obs2, (B2, obs_dim), jnp.float32)
    out2 = determ_policy_forward(obs2, weight, bias, degree=degree,
                                 add_bias=True, block_b=16)
    out2 = jax.block_until_ready(out2)
    ref2 = make_features_ref(obs2, degree) @ weight.T + bias
    assert out2.shape == (B2, act_dim)
    assert jnp.allclose(out2, ref2, atol=1e-4, rtol=1e-4), (out2, ref2)

    print("KERNEL_OK")
</pallas_src>

<mosaic_0001>
module attributes {stable_mosaic.version = 11 : i64} {
  func.func @_poly_policy_kernel(%arg0: i32, %arg1: memref<8x4xf32, #tpu.memory_space<vmem>>, %arg2: memref<128x128xf32, #tpu.memory_space<vmem>>, %arg3: memref<8x128xf32, #tpu.memory_space<vmem>>) attributes {dimension_semantics = [#tpu.dimension_semantics<parallel>], iteration_bounds = array<i64: 1>, scalar_prefetch = 0 : i64, scratch_operands = 0 : i64, tpu.core_type = #tpu.core_type<tc>, window_params = [{transform_indices = @transform_0, window_bounds = array<i64: 8, 4>}, {pipeline_mode = #tpu.pipeline_mode<synchronous>, transform_indices = @transform_1, window_bounds = array<i64: 128, 128>}, {transform_indices = @transform_2, window_bounds = array<i64: 8, 128>}]} {
    %c0 = arith.constant 0 : index
    %c0_0 = arith.constant 0 : index
    %0 = vector.load %arg1[%c0, %c0_0] : memref<8x4xf32, #tpu.memory_space<vmem>>, vector<8x4xf32>
    %1 = vector.extract_strided_slice %0 {offsets = [0, 0], sizes = [8, 1], strides = [1, 1]} : vector<8x4xf32> to vector<8x1xf32>
    %2 = vector.broadcast %1 : vector<8x1xf32> to vector<8x4xf32>
    %3 = arith.mulf %0, %2 : vector<8x4xf32>
    %4 = vector.extract_strided_slice %0 {offsets = [0, 1], sizes = [8, 1], strides = [1, 1]} : vector<8x4xf32> to vector<8x1xf32>
    %5 = vector.broadcast %4 : vector<8x1xf32> to vector<8x4xf32>
    %6 = arith.mulf %0, %5 : vector<8x4xf32>
    %7 = vector.extract_strided_slice %0 {offsets = [0, 2], sizes = [8, 1], strides = [1, 1]} : vector<8x4xf32> to vector<8x1xf32>
    %8 = vector.broadcast %7 : vector<8x1xf32> to vector<8x4xf32>
    %9 = arith.mulf %0, %8 : vector<8x4xf32>
    %10 = vector.extract_strided_slice %0 {offsets = [0, 3], sizes = [8, 1], strides = [1, 1]} : vector<8x4xf32> to vector<8x1xf32>
    %11 = vector.broadcast %10 : vector<8x1xf32> to vector<8x4xf32>
    %12 = arith.mulf %0, %11 : vector<8x4xf32>
    %13 = tpu.concatenate %3, %6, %9, %12 in 1 : vector<8x4xf32>, vector<8x4xf32>, vector<8x4xf32>, vector<8x4xf32> -> vector<8x16xf32>
    %14 = vector.extract_strided_slice %0 {offsets = [0, 0], sizes = [8, 1], strides = [1, 1]} : vector<8x4xf32> to vector<8x1xf32>
    %15 = vector.broadcast %14 : vector<8x1xf32> to vector<8x16xf32>
    %16 = arith.mulf %13, %15 : vector<8x16xf32>
    %17 = vector.extract_strided_slice %0 {offsets = [0, 1], sizes = [8, 1], strides = [1, 1]} : vector<8x4xf32> to vector<8x1xf32>
    %18 = vector.broadcast %17 : vector<8x1xf32> to vector<8x16xf32>
    %19 = arith.mulf %13, %18 : vector<8x16xf32>
    %20 = vector.extract_strided_slice %0 {offsets = [0, 2], sizes = [8, 1], strides = [1, 1]} : vector<8x4xf32> to vector<8x1xf32>
    %21 = vector.broadcast %20 : vector<8x1xf32> to vector<8x16xf32>
    %22 = arith.mulf %13, %21 : vector<8x16xf32>
    %23 = vector.extract_strided_slice %0 {offsets = [0, 3], sizes = [8, 1], strides = [1, 1]} : vector<8x4xf32> to vector<8x1xf32>
    %24 = vector.broadcast %23 : vector<8x1xf32> to vector<8x16xf32>
    %25 = arith.mulf %13, %24 : vector<8x16xf32>
    %26 = tpu.concatenate %16, %19, %22, %25 in 1 : vector<8x16xf32>, vector<8x16xf32>, vector<8x16xf32>, vector<8x16xf32> -> vector<8x64xf32>
    %cst = arith.constant 1.000000e+00 : f32
    %27 = vector.broadcast %cst : f32 to vector<8x1xf32>
    %cst_1 = arith.constant 0.000000e+00 : f32
    %28 = vector.broadcast %cst_1 : f32 to vector<8x43xf32>
    %29 = tpu.concatenate %0, %13, %26, %27, %28 in 1 : vector<8x4xf32>, vector<8x16xf32>, vector<8x64xf32>, vector<8x1xf32>, vector<8x43xf32> -> vector<8x128xf32>
    %c0_2 = arith.constant 0 : index
    %c0_3 = arith.constant 0 : index
    %30 = vector.load %arg2[%c0_2, %c0_3] : memref<128x128xf32, #tpu.memory_space<vmem>>, vector<128x128xf32>
    %cst_4 = arith.constant dense<0.000000e+00> : vector<8x128xf32>
    %31 = tpu.matmul %29, %30, %cst_4 {dimension_numbers = #tpu.dot_dimension_numbers<[1], [0], [0], [1], [0, 0, 1, 1], [], []>} : vector<8x128xf32>, vector<128x128xf32>, vector<8x128xf32> -> vector<8x128xf32>
    %c0_5 = arith.constant 0 : index
    %c0_6 = arith.constant 0 : index
    %32 = vector.load %arg3[%c0_5, %c0_6] : memref<8x128xf32, #tpu.memory_space<vmem>>, vector<8x128xf32>
    tpu.vector_store %arg3[%c0_5, %c0_6], %31 {strides = array<i32>} : memref<8x128xf32, #tpu.memory_space<vmem>>, vector<8x128xf32>,
    return
  }
  func.func @transform_0(%arg0: i32) -> (i32, i32) {
    %c0_i32 = arith.constant 0 : i32
    %c0_i32_0 = arith.constant 0 : i32
    return %arg0, %c0_i32 : i32, i32
  }
  func.func @transform_1(%arg0: i32) -> (i32, i32) {
    %c0_i32 = arith.constant 0 : i32
    %c0_i32_0 = arith.constant 0 : i32
    %c0_i32_1 = arith.constant 0 : i32
    return %c0_i32, %c0_i32_0 : i32, i32
  }
  func.func @transform_2(%arg0: i32) -> (i32, i32) {
    %c0_i32 = arith.constant 0 : i32
    %c0_i32_0 = arith.constant 0 : i32
    return %arg0, %c0_i32 : i32, i32
  }
}

</mosaic_0001>

<bundles_post_ra>
// kernel: tpu_custom_call.1
= control target key start
LH: loop header
LB: loop body
LE: loop exit
PB: predicated region body
PF: predicated region fallthrough
CT: control target
= control target key end

     0   :  { %7 = vsyncpa [#allocation3], 0  ;;  %s430_s0 = inlined_call_operand.vmem [shape: f32[8,4], index: 0, kind: input, shape index: {}]   ;;  %s431_s1 = inlined_call_operand.hbm [shape: f32[128,128], index: 1, kind: input, shape index: {}]   ;;  %s432_s2 = inlined_call_operand.hbm [shape: f32[8,128], index: 2, kind: output, shape index: {}]  }
   0x1   :  { %8 = vsyncpa [#allocation4], 0  ;;  %s352_s9 = smov [#allocation2]   ;;  %s304_s13 = scalar_lea.hbm %s431_s1, 2048 }
   0x2   :  { %s16_s10 = sshll.u32 %s352_s9, 4  ;;  %p305_p0 = scmp.ne.s32.totalorder %s431_s1, %s304_s13  ;;  %s17_s10 = int_to_ptr.vmem [resolvable:$true] %s16_s10 }
   0x3   :  { %p308_p1 = scmp.lt.u32.totalorder %s304_s13, %s431_s1 }
   0x5   :  { %p310_p2 = pnand %p308_p1, %p305_p0 }
   0x7   :  { %313 = shalt.err (!%p310_p2)
}
   0x8   :  { %s314_s18 = scalar_lea.vmem %s17_s10, 2048  ;;  %p319_p4 = scmp.lt.s32.totalorder %s17_s10, %s17_s10 }
   0x9   :  { %p315_p3 = scmp.ne.s32.totalorder %s17_s10, %s314_s18  ;;  %p320_p5 = scmp.lt.s32.totalorder %s314_s18, %s314_s18 }
   0xb   :  { %p321_p6 = por %p320_p5, %p319_p4 }
   0xd   :  { %p322_p7 = pnand %p321_p6, %p315_p3 }
   0xf   :  { %325 = shalt.err (!%p322_p7)
}
  0x10   :  { %s353_s19 = smov 128   ;;  %s354_s20 = smov 8  }
  0x11   :  { %22 = dma.hbm_to_vmem [thread:$0]  %s431_s1, 2048, %s17_s10, [#allocation3], %s353_s19, %s353_s19, %s354_s20  }
  0x12   :  { %348 = dma.done.wait [#allocation3], 2048  }
  0x13   :  { %349 = vsyncadd [#allocation3], 4294965248  ;;  %v355_v0 = vmov 1   ;;  %v356_v1 = vmov 3   ;;  %v399_v2 = vld [vmem:[%s430_s0] sm:$0xff]  ;;  %v357_v3 = vmov 2  }
  0x14   :  { %299 = vset.pattern.permute.xlu0 %v355_v0  ;;  %301 = vset.pattern.permute.xlu1 %v356_v1  ;;  %v358_v4 = vmov 0   ;;  %s359_s1 = smov 4   ;;  %s360_s0 = smov 12   ;;  %vm60_vm0 = vcmask 31744   ;;  %v103_v14 = vld [vmem:[#allocation2] sm:$0xff]  ;;  %v104_v15 = vld [vmem:[#allocation2 + $0x8] sm:$0xff] }
  0x15   :  { %34 = vperm.xlu0 %299, %v399_v2   ;;  %44 = vperm.xlu1 %301, %v399_v2   ;;  %v105_v16 = vld [vmem:[#allocation2 + $0x10] sm:$0xff]  ;;  %vm62_vm1 = vcmask 64512   ;;  %v361_v17 = vmov 0.0|0.0   ;;  %v259_v18 = vpack.c.bf16 %v104_v15, %v103_v14  ;;  %v106_v19 = vld [vmem:[#allocation2 + $0x18] sm:$0xff]  ;;  %vm64_vm2 = vcmask 97280   ;;  %v107_v25 = vld [vmem:[#allocation2 + $0x20] sm:$0xff] }
  0x16   :  { %258 = vmatprep.subr.bf16.mxu0 %v361_v17  ;;  %v262_v23 = vpack.c.bf16 %v106_v19, %v105_v16  ;;  %v108_v26 = vld [vmem:[#allocation2 + $0x28] sm:$0xff]  ;;  %s362_s25 = smov 32   ;;  %s363_s26 = smov 16   ;;  %v109_v31 = vld [vmem:[#allocation2 + $0x30] sm:$0xff]  ;;  %v110_v32 = vld [vmem:[#allocation2 + $0x38] sm:$0xff]  ;;  %vm365_vm3 = vmmov 0  }
  0x17   :  { %260 = vmatpush3.bf16.msra.mxu0 %v259_v18  ;;  %v265_v30 = vpack.c.bf16 %v108_v26, %v107_v25  ;;  %v268_v34 = vpack.c.bf16 %v110_v32, %v109_v31  ;;  %s364_s27 = smov 48   ;;  %v111_v35 = vld [vmem:[#allocation2 + $0x40] sm:$0xff]  ;;  %v112_v36 = vld [vmem:[#allocation2 + $0x48] sm:$0xff]  ;;  %v113_v38 = vld [vmem:[#allocation2 + $0x50] sm:$0xff]  ;;  %v366_v47 = vmov 0.0   ;;  %vm82_vm4 = vcmask 130048  }
  0x18   :  { %261 = vmatprep.subr.bf16.mxu0 %v361_v17  ;;  %v271_v37 = vpack.c.bf16 %v112_v36, %v111_v35  ;;  %v114_v39 = vld [vmem:[#allocation2 + $0x58] sm:$0xff]  ;;  %v115_v41 = vld [vmem:[#allocation2 + $0x60] sm:$0xff]  ;;  %v116_v42 = vld [vmem:[#allocation2 + $0x68] sm:$0xff]  ;;  %255 = vmatprep.mubr.msk.f32.mxu0 %vm365_vm3, %v366_v47  ;;  %vm84_vm5 = vcmask 261120   ;;  %vm86_vm6 = vcmask 392192   ;;  %s367_s28 = smov 20  }
  0x19   :  { %300 = vset.pattern.permute.xlu0 %v357_v3  ;;  %302 = vset.pattern.permute.xlu1 %v358_v4  ;;  %v274_v40 = vpack.c.bf16 %v114_v39, %v113_v38  ;;  %v277_v43 = vpack.c.bf16 %v116_v42, %v115_v41  ;;  %v117_v44 = vld [vmem:[#allocation2 + $0x70] sm:$0xff]  ;;  %v118_v45 = vld [vmem:[#allocation2 + $0x78] sm:$0xff]  ;;  %vm97_vm7 = vcmask 162816   ;;  %vm99_vm8 = vcmask 687104   ;;  %s368_s29 = smov [#allocation5]  }
  0x1a   :  { %39 = vperm.xlu0 %300, %v399_v2   ;;  %29 = vperm.xlu1 %302, %v399_v2   ;;  %v280_v46 = vpack.c.bf16 %v118_v45, %v117_v44  ;;  %vm101_vm9 = vcmask 695296   ;;  %s196_s30 = sshll.u32 %s368_s29, 4  ;;  %s197_s30 = int_to_ptr.vmem [resolvable:$true] %s196_s30 }
  0x1b   :  { %263 = vmatpush3.bf16.msra.mxu0 %v262_v23  ;;  %s326_s3 = scalar_lea.vmem %s197_s30, 128  ;;  %p331_p9 = scmp.lt.s32.totalorder %s197_s30, %s197_s30 }
  0x1c   :  { %264 = vmatprep.subr.bf16.mxu0 %v361_v17  ;;  %p327_p8 = scmp.ne.s32.totalorder %s197_s30, %s326_s3  ;;  %p332_p10 = scmp.lt.s32.totalorder %s326_s3, %s326_s3 }
  0x1e   :  { %303 = vset.pattern.permute.xlu0 %v356_v1  ;;  %p333_p11 = por %p332_p10, %p331_p9 }
  0x1f   :  { %266 = vmatpush3.bf16.msra.mxu0 %v265_v30 }
  0x20   :  { %267 = vmatprep.subr.bf16.mxu0 %v361_v17  ;;  %p334_p12 = pnand %p333_p11, %p327_p8 }
  0x23   :  { %269 = vmatpush3.bf16.msra.mxu0 %v268_v34 }
  0x24   :  { %270 = vmatprep.subr.bf16.mxu0 %v361_v17 }
  0x27   :  { %272 = vmatpush3.bf16.msra.mxu0 %v271_v37 }
  0x28   :  { %273 = vmatprep.subr.bf16.mxu0 %v361_v17 }
  0x2b   :  { %275 = vmatpush3.bf16.msra.mxu0 %v274_v40 }
  0x2c   :  { %276 = vmatprep.subr.bf16.mxu0 %v361_v17 }
  0x2f   :  { %278 = vmatpush3.bf16.msra.mxu0 %v277_v43 }
  0x30   :  { %279 = vmatprep.subr.bf16.mxu0 %v361_v17 }
  0x33   :  { %281 = vmatpush3.bf16.msra.mxu0 %v280_v46 }
  0x94   :  { %v35_v5 = vpop.permute.xlu0 %34  ;;  %v45_v6 = vpop.permute.xlu1 %44 }
  0x95   :  { %v37_v7 = vmul.f32 %v35_v5, %v399_v2  ;;  %v47_v8 = vmul.f32 %v45_v6, %v399_v2 }
  0x97   :  { %49 = vrot.lane.b32.xlu1 %v37_v7, %s359_s1 }
  0x99   :  { %v40_v9 = vpop.permute.xlu0 %39  ;;  %v409_v11 = vpop.permute.xlu1 %29 }
  0x9a   :  { %v42_v10 = vmul.f32 %v40_v9, %v399_v2  ;;  %v32_v13 = vmul.f32 %v409_v11, %v399_v2 }
  0x9b   :  { %57 = vrot.lane.b32.xlu1 %v47_v8, %s360_s0 }
  0x9c   :  { %53 = vrot.lane.b32.xlu0 %v42_v10, %s354_s20 }
 0x109   :  { %v50_v12 = vpop.permute.xlu1 %49 }
 0x10a   :  { %v61_v21 = vsel %vm60_vm0, %v32_v13, %v50_v12 }
 0x10d   :  { %v58_v20 = vpop.permute.xlu1 %57 }
 0x10e   :  { %v54_v22 = vpop.permute.xlu0 %53 }
 0x10f   :  { %v63_v24 = vsel %vm62_vm1, %v61_v21, %v54_v22 }
 0x110   :  { %v65_v27 = vsel %vm64_vm2, %v63_v24, %v58_v20 }
 0x111   :  { %v68_v28 = vmul.f32 %v65_v27, %v40_v9  ;;  %v67_v29 = vmul.f32 %v65_v27, %v35_v5  ;;  %v69_v33 = vmul.f32 %v65_v27, %v45_v6  ;;  %v66_v48 = vmul.f32 %v65_v27, %v409_v11 }
 0x113   :  { %75 = vrot.lane.b32.xlu1 %v68_v28, %s362_s25  ;;  %71 = vrot.lane.b32.xlu0 %v67_v29, %s363_s26 }
 0x117   :  { %89 = vrot.lane.b32.xlu1 %v65_v27, %s359_s1  ;;  %79 = vrot.lane.b32.xlu0 %v69_v33, %s364_s27 }
 0x185   :  { %v72_v49 = vpop.permute.xlu0 %71  ;;  %v76_v50 = vpop.permute.xlu1 %75 }
 0x186   :  { %v83_v51 = vsel %vm82_vm4, %v66_v48, %v72_v49 }
 0x187   :  { %v85_v53 = vsel %vm84_vm5, %v83_v51, %v76_v50 }
 0x189   :  { %v80_v52 = vpop.permute.xlu0 %79  ;;  %v90_v55 = vpop.permute.xlu1 %89 }
 0x18a   :  { %v87_v54 = vsel %vm86_vm6, %v85_v53, %v80_v52  ;;  %v96_v56 = vsel %vm60_vm0, %v399_v2, %v90_v55 }
 0x18b   :  { %93 = vrot.lane.b32.xlu0 %v87_v54, %s367_s28 }
 0x1fd   :  { %v94_v57 = vpop.permute.xlu0 %93 }
 0x1fe   :  { %v98_v58 = vsel %vm97_vm7, %v96_v56, %v94_v57 }
 0x1ff   :  { %v100_v59 = vsel %vm99_vm8, %v98_v58, 1.0 }
 0x200   :  { %256 = vmatmul.mubr.msk.f32.vlgmr.msra.gmra.mrb[0].mxu0 %vm101_vm9, %v100_v59 }
 0x2d3   :  { %v185_v60 = vpop.f32.mrb[0].mxu0 }
 0x2d4   :  { %189 = vst [vmem:[#allocation5] sm:$0xff] %v185_v60  ;;  %v257_v61 = vpop.f32.mrb[1].mxu0 }
 0x2d5   :  { %337 = shalt.err (!%p334_p12)
}
 0x2d6   :  { %s338_s6 = scalar_lea.hbm %s432_s2, 128 }
 0x2d7   :  { %p339_p13 = scmp.ne.s32.totalorder %s432_s2, %s338_s6  ;;  %p342_p0 = scmp.lt.u32.totalorder %s338_s6, %s432_s2 }
 0x2d9   :  { %p344_p1 = pnand %p342_p0, %p339_p13 }
 0x2db   :  { %347 = shalt.err (!%p344_p1)
}
 0x2dc   :  { %199 = dma.vmem_to_hbm [thread:$0]  %s197_s30, 128, %s432_s2, [#allocation4]  }
 0x2dd   :  { %350 = dma.done.wait [#allocation4], 128  }
 0x2de   :  { %351 = vsyncadd [#allocation4], 4294967168 }
 0x2df   :  { %203 = vsyncpa [#allocation3], 1 }
 0x2e0   :  { %204 = vsyncpa [#allocation4], 1 }

</bundles_post_ra>
